<compile_context>
chip_gen: v7x
topology: tpu7x:2x2x1
jax: 0.10.0
libtpu: 0.0.40
codegen_flags: <defaults>
</compile_context>

<pallas_src>
import functools

import jax
import jax.numpy as jnp
from jax.experimental import pallas as pl
from jax.experimental.pallas import tpu as pltpu


def _label_embed_kernel(labels_ref, table_ref, out_ref):
    """Gather TB rows of the VMEM-resident table into a dense (TB, H) block.

    labels_ref: (B_pad,) int32 in SMEM (scalar prefetch).
    table_ref:  (V, H) full embedding table, resident in VMEM.
    out_ref:    (TB, H) output block for this grid step.
    """
    tb = out_ref.shape[0]                      # static
    base = pl.program_id(0) * tb               # first label handled by this step
    # Exact per-row gather: dynamic sublane-indexed VMEM reads, static-index stores.
    # (For TB >= 128 a one-hot @ table MXU matmul amortizes better; kept exact here.)
    for t in range(tb):                        # static unroll
        lbl = labels_ref[base + t]             # scalar read from SMEM
        out_ref[pl.ds(t, 1), :] = table_ref[pl.ds(lbl, 1), :].astype(out_ref.dtype)


def label_embedder_forward(labels, embedding_table, *, num_classes,
                           dropout_prob, train, drop_rng=None,
                           force_drop_ids=None, block_labels=8):
    """LabelEmbedder.forward.

    labels:          (B,) integer class ids.
    embedding_table: (num_classes + use_cfg, hidden) weights.
    drop_rng:        jax PRNG key replacing torch.rand() in token_drop
                     (kernel-external randomness made explicit).
    force_drop_ids:  optional (B,) int array; ==1 forces the CFG drop.
    block_labels:    labels per grid step (multiple of 8; use 128-512 for real
                     DiT batches).
    Returns (B, hidden) embeddings, dtype of the table.
    """
    B = labels.shape[0]
    V, H = embedding_table.shape
    labels = labels.astype(jnp.int32)

    # --- token_drop (classifier-free guidance) ---------------------------------
    use_dropout = dropout_prob > 0
    if (train and use_dropout) or (force_drop_ids is not None):
        if force_drop_ids is not None:
            drop_ids = (force_drop_ids == 1)
        else:
            assert drop_rng is not None, "drop_rng required when train & dropout_prob > 0"
            drop_ids = jax.random.uniform(drop_rng, (B,)) < dropout_prob
        labels = jnp.where(drop_ids, jnp.int32(num_classes), labels)

    # Clamp so an out-of-range label can never drive an OOB VMEM read inside the
    # kernel (same behavior as jnp's clamping gather in the reference).
    labels = jnp.clip(labels, 0, V - 1)

    # --- pad batch to a multiple of the per-step block -------------------------
    tb = max(8, block_labels)
    tb += (-tb) % 8                             # TB multiple of 8 (sublane-dense)
    b_pad = B + (-B) % tb
    if b_pad != B:
        labels = jnp.pad(labels, (0, b_pad - B))  # pad with a valid row (0)
    nb = b_pad // tb

    dtype = embedding_table.dtype
    dsize = jnp.dtype(dtype).itemsize
    cost = pl.CostEstimate(
        flops=0,
        transcendentals=0,
        bytes_accessed=V * H * dsize + b_pad * H * dsize + b_pad * 4,
    )

    out = pl.pallas_call(
        _label_embed_kernel,
        out_shape=jax.ShapeDtypeStruct((b_pad, H), dtype),
        grid_spec=pltpu.PrefetchScalarGridSpec(
            num_scalar_prefetch=1,              # labels -> SMEM
            grid=(nb,),
            in_specs=[
                # Whole table resident in VMEM; constant block index => fetched once.
                pl.BlockSpec((V, H), lambda i, labels_sref: (0, 0)),
            ],
            out_specs=pl.BlockSpec((tb, H), lambda i, labels_sref: (i, 0)),
        ),
        compiler_params=pltpu.CompilerParams(
            dimension_semantics=("parallel",)),  # megacore-shard label blocks (v7x)
        cost_estimate=cost,
    )(labels, embedding_table)

    return out[:B]


def reference_forward(labels, embedding_table, *, num_classes, dropout_prob,
                      train, drop_rng=None, force_drop_ids=None):
    labels = labels.astype(jnp.int32)
    use_dropout = dropout_prob > 0
    if (train and use_dropout) or (force_drop_ids is not None):
        if force_drop_ids is not None:
            drop_ids = (force_drop_ids == 1)
        else:
            drop_ids = jax.random.uniform(drop_rng, (labels.shape[0],)) < dropout_prob
        labels = jnp.where(drop_ids, jnp.int32(num_classes), labels)
    return embedding_table[labels]


if __name__ == "__main__":
    key = jax.random.PRNGKey(0)
    k_tab, k_lab, k_drop = jax.random.split(key, 3)

    # Small shapes consistent with the module: batch=8, num_classes=16, hidden=128
    # (H multiple of 128 -> lane-dense stores; TB=8 -> sublane-dense output tiles).
    B, num_classes, hidden = 8, 16, 128
    dropout_prob = 0.1
    use_cfg = 1  # dropout_prob > 0 -> one extra CFG embedding row

    embedding_table = jax.random.normal(
        k_tab, (num_classes + use_cfg, hidden), jnp.float32) * 0.02
    labels = jax.random.randint(k_lab, (B,), 0, num_classes, jnp.int32)

    # Path 1: training with random label dropout (torch.rand replaced by an
    # explicit PRNG key so kernel and reference see identical drop decisions).
    out = label_embedder_forward(labels, embedding_table,
                                 num_classes=num_classes,
                                 dropout_prob=dropout_prob,
                                 train=True, drop_rng=k_drop,
                                 block_labels=8)
    out = jax.block_until_ready(out)
    ref = reference_forward(labels, embedding_table,
                            num_classes=num_classes,
                            dropout_prob=dropout_prob,
                            train=True, drop_rng=k_drop)
    assert out.shape == (B, hidden)
    assert jnp.allclose(out, ref, atol=0.0, rtol=0.0)

    # Path 2: eval with force_drop_ids (drops every other label).
    force = (jnp.arange(B) % 2).astype(jnp.int32)
    out2 = jax.block_until_ready(
        label_embedder_forward(labels, embedding_table,
                               num_classes=num_classes,
                               dropout_prob=dropout_prob,
                               train=False, force_drop_ids=force,
                               block_labels=8))
    ref2 = reference_forward(labels, embedding_table,
                             num_classes=num_classes,
                             dropout_prob=dropout_prob,
                             train=False, force_drop_ids=force)
    assert jnp.allclose(out2, ref2, atol=0.0, rtol=0.0)

    # Path 3: eval, no dropout, batch not a multiple of the block (padding path).
    labels3 = jax.random.randint(jax.random.PRNGKey(7), (5,), 0, num_classes, jnp.int32)
    out3 = jax.block_until_ready(
        label_embedder_forward(labels3, embedding_table,
                               num_classes=num_classes,
                               dropout_prob=dropout_prob,
                               train=False, block_labels=8))
    ref3 = reference_forward(labels3, embedding_table,
                             num_classes=num_classes,
                             dropout_prob=dropout_prob,
                             train=False)
    assert out3.shape == (5, hidden)
    assert jnp.allclose(out3, ref3, atol=0.0, rtol=0.0)

    print("KERNEL_OK")
</pallas_src>

<mosaic_0001>
module attributes {stable_mosaic.version = 11 : i64} {
  func.func @_label_embed_kernel(%arg0: i32, %arg1: memref<8xi32, #tpu.memory_space<smem>>, %arg2: memref<17x128xf32, #tpu.memory_space<vmem>>, %arg3: memref<8x128xf32, #tpu.memory_space<vmem>>) attributes {dimension_semantics = [#tpu.dimension_semantics<parallel>], iteration_bounds = array<i64: 1>, scalar_prefetch = 1 : i64, scratch_operands = 0 : i64, tpu.core_type = #tpu.core_type<tc>, window_params = [{pipeline_mode = #tpu.pipeline_mode<synchronous>, transform_indices = @transform_0, window_bounds = array<i64: 17, 128>}, {transform_indices = @transform_1, window_bounds = array<i64: 8, 128>}]} {
    %c8_i32 = arith.constant 8 : i32
    %0 = arith.muli %arg0, %c8_i32 : i32
    %c0_i32 = arith.constant 0 : i32
    %1 = arith.addi %0, %c0_i32 : i32
    %2 = arith.index_cast %1 : i32 to index
    %3 = memref.load %arg1[%2] : memref<8xi32, #tpu.memory_space<smem>>
    %4 = arith.index_cast %3 : i32 to index
    %c0 = arith.constant 0 : index
    %5 = vector.load %arg2[%4, %c0] : memref<17x128xf32, #tpu.memory_space<vmem>>, vector<1x128xf32>
    %c0_0 = arith.constant 0 : index
    %c0_1 = arith.constant 0 : index
    %6 = vector.load %arg3[%c0_0, %c0_1] : memref<8x128xf32, #tpu.memory_space<vmem>>, vector<1x128xf32>
    tpu.vector_store %arg3[%c0_0, %c0_1], %5 {strides = array<i32>} : memref<8x128xf32, #tpu.memory_space<vmem>>, vector<1x128xf32>,
    %c1_i32 = arith.constant 1 : i32
    %7 = arith.addi %0, %c1_i32 : i32
    %8 = arith.index_cast %7 : i32 to index
    %9 = memref.load %arg1[%8] : memref<8xi32, #tpu.memory_space<smem>>
    %10 = arith.index_cast %9 : i32 to index
    %c0_2 = arith.constant 0 : index
    %11 = vector.load %arg2[%10, %c0_2] : memref<17x128xf32, #tpu.memory_space<vmem>>, vector<1x128xf32>
    %c1 = arith.constant 1 : index
    %c0_3 = arith.constant 0 : index
    %12 = vector.load %arg3[%c1, %c0_3] : memref<8x128xf32, #tpu.memory_space<vmem>>, vector<1x128xf32>
    tpu.vector_store %arg3[%c1, %c0_3], %11 {strides = array<i32>} : memref<8x128xf32, #tpu.memory_space<vmem>>, vector<1x128xf32>,
    %c2_i32 = arith.constant 2 : i32
    %13 = arith.addi %0, %c2_i32 : i32
    %14 = arith.index_cast %13 : i32 to index
    %15 = memref.load %arg1[%14] : memref<8xi32, #tpu.memory_space<smem>>
    %16 = arith.index_cast %15 : i32 to index
    %c0_4 = arith.constant 0 : index
    %17 = vector.load %arg2[%16, %c0_4] : memref<17x128xf32, #tpu.memory_space<vmem>>, vector<1x128xf32>
    %c2 = arith.constant 2 : index
    %c0_5 = arith.constant 0 : index
    %18 = vector.load %arg3[%c2, %c0_5] : memref<8x128xf32, #tpu.memory_space<vmem>>, vector<1x128xf32>
    tpu.vector_store %arg3[%c2, %c0_5], %17 {strides = array<i32>} : memref<8x128xf32, #tpu.memory_space<vmem>>, vector<1x128xf32>,
    %c3_i32 = arith.constant 3 : i32
    %19 = arith.addi %0, %c3_i32 : i32
    %20 = arith.index_cast %19 : i32 to index
    %21 = memref.load %arg1[%20] : memref<8xi32, #tpu.memory_space<smem>>
    %22 = arith.index_cast %21 : i32 to index
    %c0_6 = arith.constant 0 : index
    %23 = vector.load %arg2[%22, %c0_6] : memref<17x128xf32, #tpu.memory_space<vmem>>, vector<1x128xf32>
    %c3 = arith.constant 3 : index
    %c0_7 = arith.constant 0 : index
    %24 = vector.load %arg3[%c3, %c0_7] : memref<8x128xf32, #tpu.memory_space<vmem>>, vector<1x128xf32>
    tpu.vector_store %arg3[%c3, %c0_7], %23 {strides = array<i32>} : memref<8x128xf32, #tpu.memory_space<vmem>>, vector<1x128xf32>,
    %c4_i32 = arith.constant 4 : i32
    %25 = arith.addi %0, %c4_i32 : i32
    %26 = arith.index_cast %25 : i32 to index
    %27 = memref.load %arg1[%26] : memref<8xi32, #tpu.memory_space<smem>>
    %28 = arith.index_cast %27 : i32 to index
    %c0_8 = arith.constant 0 : index
    %29 = vector.load %arg2[%28, %c0_8] : memref<17x128xf32, #tpu.memory_space<vmem>>, vector<1x128xf32>
    %c4 = arith.constant 4 : index
    %c0_9 = arith.constant 0 : index
    %30 = vector.load %arg3[%c4, %c0_9] : memref<8x128xf32, #tpu.memory_space<vmem>>, vector<1x128xf32>
    tpu.vector_store %arg3[%c4, %c0_9], %29 {strides = array<i32>} : memref<8x128xf32, #tpu.memory_space<vmem>>, vector<1x128xf32>,
    %c5_i32 = arith.constant 5 : i32
    %31 = arith.addi %0, %c5_i32 : i32
    %32 = arith.index_cast %31 : i32 to index
    %33 = memref.load %arg1[%32] : memref<8xi32, #tpu.memory_space<smem>>
    %34 = arith.index_cast %33 : i32 to index
    %c0_10 = arith.constant 0 : index
    %35 = vector.load %arg2[%34, %c0_10] : memref<17x128xf32, #tpu.memory_space<vmem>>, vector<1x128xf32>
    %c5 = arith.constant 5 : index
    %c0_11 = arith.constant 0 : index
    %36 = vector.load %arg3[%c5, %c0_11] : memref<8x128xf32, #tpu.memory_space<vmem>>, vector<1x128xf32>
    tpu.vector_store %arg3[%c5, %c0_11], %35 {strides = array<i32>} : memref<8x128xf32, #tpu.memory_space<vmem>>, vector<1x128xf32>,
    %c6_i32 = arith.constant 6 : i32
    %37 = arith.addi %0, %c6_i32 : i32
    %38 = arith.index_cast %37 : i32 to index
    %39 = memref.load %arg1[%38] : memref<8xi32, #tpu.memory_space<smem>>
    %40 = arith.index_cast %39 : i32 to index
    %c0_12 = arith.constant 0 : index
    %41 = vector.load %arg2[%40, %c0_12] : memref<17x128xf32, #tpu.memory_space<vmem>>, vector<1x128xf32>
    %c6 = arith.constant 6 : index
    %c0_13 = arith.constant 0 : index
    %42 = vector.load %arg3[%c6, %c0_13] : memref<8x128xf32, #tpu.memory_space<vmem>>, vector<1x128xf32>
    tpu.vector_store %arg3[%c6, %c0_13], %41 {strides = array<i32>} : memref<8x128xf32, #tpu.memory_space<vmem>>, vector<1x128xf32>,
    %c7_i32 = arith.constant 7 : i32
    %43 = arith.addi %0, %c7_i32 : i32
    %44 = arith.index_cast %43 : i32 to index
    %45 = memref.load %arg1[%44] : memref<8xi32, #tpu.memory_space<smem>>
    %46 = arith.index_cast %45 : i32 to index
    %c0_14 = arith.constant 0 : index
    %47 = vector.load %arg2[%46, %c0_14] : memref<17x128xf32, #tpu.memory_space<vmem>>, vector<1x128xf32>
    %c7 = arith.constant 7 : index
    %c0_15 = arith.constant 0 : index
    %48 = vector.load %arg3[%c7, %c0_15] : memref<8x128xf32, #tpu.memory_space<vmem>>, vector<1x128xf32>
    tpu.vector_store %arg3[%c7, %c0_15], %47 {strides = array<i32>} : memref<8x128xf32, #tpu.memory_space<vmem>>, vector<1x128xf32>,
    return
  }
  func.func @transform_0(%arg0: i32, %arg1: memref<8xi32, #tpu.memory_space<smem>>) -> (i32, i32) {
    %c0_i32 = arith.constant 0 : i32
    %c0_i32_0 = arith.constant 0 : i32
    %c0_i32_1 = arith.constant 0 : i32
    return %c0_i32, %c0_i32_0 : i32, i32
  }
  func.func @transform_1(%arg0: i32, %arg1: memref<8xi32, #tpu.memory_space<smem>>) -> (i32, i32) {
    %c0_i32 = arith.constant 0 : i32
    %c0_i32_0 = arith.constant 0 : i32
    return %arg0, %c0_i32 : i32, i32
  }
}

</mosaic_0001>

<bundles_post_ra>
// kernel: tpu_custom_call.1
= control target key start
LH: loop header
LB: loop body
LE: loop exit
PB: predicated region body
PF: predicated region fallthrough
CT: control target
= control target key end

     0   :  { %s226_s0 = inlined_call_operand.hbm [shape: s32[8], index: 0, kind: input, shape index: {}]   ;;  %s227_s1 = inlined_call_operand.hbm [shape: f32[17,128], index: 1, kind: input, shape index: {}]   ;;  %s228_s2 = inlined_call_operand.hbm [shape: f32[8,128], index: 2, kind: output, shape index: {}]  }
   0x1   :  { %s103_s11 = scalar_lea.hbm %s226_s0, 16 }
   0x2   :  { %p104_p0 = scmp.ne.s32.totalorder %s226_s0, %s103_s11  ;;  %p107_p1 = scmp.lt.u32.totalorder %s103_s11, %s226_s0 }
   0x4   :  { %p109_p2 = pnand %p107_p1, %p104_p0 }
   0x6   :  { %112 = shalt.err (!%p109_p2)  }
   0x7   :  { %s163_s16 = smov [#allocation3]  }
   0x8   :  { %8 = dma.hbm_to_smem %s226_s0, 16, %s163_s16, [#allocation2] }
   0x9   :  { %157 = dma.done.wait [#allocation2], 16 }
   0xa   :  { %158 = vsyncadd [#allocation2], 4294967280 }
   0xb   :  { %10 = sfence }
   0xc   :  { %11 = vsyncpa [#allocation5], 0 }
   0xd   :  { %12 = vsyncpa [#allocation6], 0  ;;  %s164_s19 = smov [#allocation4]   ;;  %s113_s23 = scalar_lea.hbm %s227_s1, 384 }
   0xe   :  { %s18_s20 = sshll.u32 %s164_s19, 4  ;;  %p114_p3 = scmp.ne.s32.totalorder %s227_s1, %s113_s23  ;;  %s19_s20 = int_to_ptr.vmem [resolvable:$true] %s18_s20 }
   0xf   :  { %p117_p4 = scmp.lt.u32.totalorder %s113_s23, %s227_s1 }
  0x11   :  { %p119_p5 = pnand %p117_p4, %p114_p3 }
  0x13   :  { %122 = shalt.err (!%p119_p5)
}
  0x14   :  { %s123_s0 = scalar_lea.vmem %s19_s20, 384  ;;  %p128_p7 = scmp.lt.s32.totalorder %s19_s20, %s19_s20 }
  0x15   :  { %p124_p6 = scmp.ne.s32.totalorder %s19_s20, %s123_s0  ;;  %p129_p8 = scmp.lt.s32.totalorder %s123_s0, %s123_s0 }
  0x17   :  { %p130_p9 = por %p129_p8, %p128_p7 }
  0x19   :  { %p131_p10 = pnand %p130_p9, %p124_p6 }
  0x1b   :  { %134 = shalt.err (!%p131_p10)
}
  0x1c   :  { %s165_s28 = smov 128   ;;  %s166_s29 = smov 8  }
  0x1d   :  { %24 = dma.hbm_to_vmem [thread:$0]  %s227_s1, 384, %s19_s20, [#allocation5], %s165_s28, %s165_s28, %s166_s29  }
  0x1e   :  { %159 = dma.done.wait [#allocation5], 384  }
  0x1f   :  { %160 = vsyncadd [#allocation5], 4294966912  ;;  %s29_s4 = sld [smem:[#allocation3]]  ;;  %s91_s5 = sld [smem:[#allocation3 + $0x1]] }
  0x20   :  { %s92_s6 = sld [smem:[#allocation3 + $0x2]]  ;;  %s93_s7 = sld [smem:[#allocation3 + $0x3]] }
  0x21   :  { %s94_s8 = sld [smem:[#allocation3 + $0x4]]  ;;  %s95_s9 = sld [smem:[#allocation3 + $0x5]] }
  0x22   :  { %s96_s10 = sld [smem:[#allocation3 + $0x6]]  ;;  %s97_s11 = sld [smem:[#allocation3 + $0x7]] }
  0x23   :  { %s167_s12 = smov [#allocation7]  }
  0x24   :  { %s74_s13 = sshll.u32 %s167_s12, 4  ;;  %s207_s13 = int_to_ptr.vmem [resolvable:$true] %s74_s13 }
  0x25   :  { %s30_s14 = scalar_lea.vmem [#allocation4], %s29_s4  ;;  %s35_s15 = scalar_lea.vmem [#allocation4], %s91_s5 }
  0x26   :  { %v31_v0 = vld [vmem:[%s30_s14] sm:$0x1]  ;;  %s40_s1 = scalar_lea.vmem [#allocation4], %s92_s6  ;;  %s45_s16 = scalar_lea.vmem [#allocation4], %s93_s7 }
  0x27   :  { %v36_v1 = vld [vmem:[%s35_s15] sm:$0x1]  ;;  %32 = vst [vmem:[#allocation7] sm:$0x1] %v31_v0  ;;  %s50_s17 = scalar_lea.vmem [#allocation4], %s94_s8  ;;  %s55_s18 = scalar_lea.vmem [#allocation4], %s95_s9 }
  0x28   :  { %37 = vst [vmem:[#allocation7 + $0x1] sm:$0x1] %v36_v1  ;;  %v41_v2 = vld [vmem:[%s40_s1] sm:$0x1]  ;;  %s60_s19 = scalar_lea.vmem [#allocation4], %s96_s10  ;;  %s65_s20 = scalar_lea.vmem [#allocation4], %s97_s11 }
  0x29   :  { %v46_v3 = vld [vmem:[%s45_s16] sm:$0x1]  ;;  %42 = vst [vmem:[#allocation7 + $0x2] sm:$0x1] %v41_v2  ;;  %s135_s21 = scalar_lea.vmem %s207_s13, 128  ;;  %p140_p12 = scmp.lt.s32.totalorder %s207_s13, %s207_s13 }
  0x2a   :  { %47 = vst [vmem:[#allocation7 + $0x3] sm:$0x1] %v46_v3  ;;  %v51_v4 = vld [vmem:[%s50_s17] sm:$0x1]  ;;  %p136_p11 = scmp.ne.s32.totalorder %s207_s13, %s135_s21  ;;  %p141_p13 = scmp.lt.s32.totalorder %s135_s21, %s135_s21 }
  0x2b   :  { %v56_v5 = vld [vmem:[%s55_s18] sm:$0x1]  ;;  %52 = vst [vmem:[#allocation7 + $0x4] sm:$0x1] %v51_v4 }
  0x2c   :  { %57 = vst [vmem:[#allocation7 + $0x5] sm:$0x1] %v56_v5  ;;  %v61_v6 = vld [vmem:[%s60_s19] sm:$0x1]  ;;  %p142_p0 = por %p141_p13, %p140_p12 }
  0x2d   :  { %v66_v7 = vld [vmem:[%s65_s20] sm:$0x1]  ;;  %62 = vst [vmem:[#allocation7 + $0x6] sm:$0x1] %v61_v6 }
  0x2e   :  { %67 = vst [vmem:[#allocation7 + $0x7] sm:$0x1] %v66_v7  ;;  %p143_p1 = pnand %p142_p0, %p136_p11 }
  0x30   :  { %146 = shalt.err (!%p143_p1)
}
  0x31   :  { %s147_s24 = scalar_lea.hbm %s228_s2, 128 }
  0x32   :  { %p148_p2 = scmp.ne.s32.totalorder %s228_s2, %s147_s24  ;;  %p151_p3 = scmp.lt.u32.totalorder %s147_s24, %s228_s2 }
  0x34   :  { %p153_p4 = pnand %p151_p3, %p148_p2 }
  0x36   :  { %156 = shalt.err (!%p153_p4)
}
  0x37   :  { %77 = dma.vmem_to_hbm [thread:$0]  %s207_s13, 128, %s228_s2, [#allocation6]  }
  0x38   :  { %161 = dma.done.wait [#allocation6], 128  }
  0x39   :  { %162 = vsyncadd [#allocation6], 4294967168 }
  0x3a   :  { %81 = vsyncpa [#allocation5], 1 }
  0x3b   :  { %82 = vsyncpa [#allocation6], 1 }

</bundles_post_ra>
